<compile_context>
chip_gen: v5e
topology: v5e:2x2
jax: 0.10.0
libtpu: 0.0.40
codegen_flags: <defaults>
</compile_context>

<pallas_src>
import jax
import jax.numpy as jnp
from jax.experimental import pallas as pl
from jax.experimental.pallas import tpu as pltpu


def _round_up(a, b):
    return (a + b - 1) // b * b


def _highway_gate_kernel(x_ref, y_ref, wt_ref, b_ref, o_ref):
    # x_ref, y_ref, o_ref: (tm, Dp)
    # wt_ref: (Dp, Dp) = W.T (already transposed in the wrapper -> MXU-native RHS)
    # b_ref: (1, Dp) float32
    x = x_ref[...]
    y = y_ref[...]
    # Linear(x) = x @ W.T ; wt_ref already holds W.T, so this is a plain
    # (K-major LHS) x (K, N) RHS contraction — the MXU's native feed.
    z = jnp.dot(x, wt_ref[...], preferred_element_type=jnp.float32)
    t = jax.nn.sigmoid(z + b_ref[...])            # exp rides the EUP slot, f32
    xf = x.astype(jnp.float32)
    yf = y.astype(jnp.float32)
    # Highway blend: t*x + (1-t)*y == y + t*(x - y), computed in f32 and cast
    # exactly once at the store.
    o_ref[...] = (yf + t * (xf - yf)).astype(o_ref.dtype)


def highway_gate(x, y, weight, bias, *, tm=512):
    """x, y: [N, D]; weight: [D, D] in PyTorch (out, in) layout; bias: [D]."""
    N, D = x.shape
    assert y.shape == (N, D)
    assert weight.shape == (D, D)
    assert bias.shape == (D,)

    dtype = x.dtype
    sublane = 16 if dtype == jnp.bfloat16 else 8
    itemsize = jnp.dtype(dtype).itemsize

    # Lane-dense feature dim: pad up to a multiple of 128 (only if needed).
    Dp = _round_up(D, 128)

    # bf16 activations -> bf16 weight (half the weight DMA, bf16 MXU rate);
    # accumulation stays f32 via preferred_element_type.
    w_dtype = jnp.bfloat16 if dtype == jnp.bfloat16 else weight.dtype
    w_itemsize = jnp.dtype(w_dtype).itemsize
    w_bytes = Dp * Dp * w_itemsize

    # Generation-aware VMEM budget: ~78% of physical VMEM
    # (v5e/v6e: 128 MiB -> ~100 MiB; v7x per-TC: 64 MiB -> ~50 MiB).
    try:
        phys_vmem = int(pltpu.get_tpu_info().vmem_capacity_bytes)
    except Exception:  # pragma: no cover - conservative fallback (v7x per-TC)
        phys_vmem = 64 << 20
    vmem_cap = int(phys_vmem * 0.78)

    def vmem_need(rows):
        act = 2 * 3 * rows * Dp * itemsize      # double-buffered x, y, out tiles
        inter = 2 * rows * Dp * 4               # f32 z and t live intermediates
        resident = 2 * (w_bytes + Dp * 4)       # weight + bias (assume 2 buffers)
        return act + inter + resident + (2 << 20)   # compiler-internal headroom

    # Largest row tile <= tm that is a sublane multiple, no larger than the
    # (sublane-rounded) row count, and fits the per-generation VMEM budget.
    tm_eff = max(sublane, min(_round_up(tm, sublane), _round_up(N, sublane)))
    while tm_eff > sublane and vmem_need(tm_eff) > vmem_cap:
        tm_eff = max(sublane, _round_up(tm_eff // 2, sublane))

    # One-time wrapper-side transpose (+ optional bf16 cast) of the weight:
    # D^2 elements, negligible vs. N*D activation traffic.
    wt = weight.T.astype(w_dtype)

    if Dp != D:
        # Feature padding only; pad lanes of x and pad rows of W.T are zero,
        # so valid output columns are numerically untouched.
        x_in = jnp.zeros((N, Dp), dtype).at[:, :D].set(x)
        y_in = jnp.zeros((N, Dp), dtype).at[:, :D].set(y)
        wt_in = jnp.zeros((Dp, Dp), w_dtype).at[:D, :D].set(wt)
        b_in = jnp.zeros((1, Dp), jnp.float32).at[0, :D].set(bias.astype(jnp.float32))
    else:
        x_in, y_in = x, y
        wt_in = wt
        b_in = bias.astype(jnp.float32).reshape(1, D)

    vmem_limit = int(min(max(vmem_need(tm_eff), 32 << 20), vmem_cap))

    grid = (pl.cdiv(N, tm_eff),)   # ragged last row-block is masked by Pallas

    out = pl.pallas_call(
        _highway_gate_kernel,
        out_shape=jax.ShapeDtypeStruct((N, Dp), dtype),
        grid_spec=pltpu.PrefetchScalarGridSpec(
            num_scalar_prefetch=0,
            grid=grid,
            in_specs=[
                pl.BlockSpec((tm_eff, Dp), lambda i: (i, 0)),   # x tile
                pl.BlockSpec((tm_eff, Dp), lambda i: (i, 0)),   # y tile
                pl.BlockSpec((Dp, Dp), lambda i: (0, 0)),       # W.T, resident
                pl.BlockSpec((1, Dp), lambda i: (0, 0)),        # bias row
            ],
            out_specs=pl.BlockSpec((tm_eff, Dp), lambda i: (i, 0)),
        ),
        compiler_params=pltpu.CompilerParams(
            dimension_semantics=("parallel",),
            vmem_limit_bytes=vmem_limit,
        ),
    )(x_in, y_in, wt_in, b_in)

    if Dp != D:
        out = out[:, :D]
    return out


def highway_gate_ref(x, y, weight, bias):
    t = jax.nn.sigmoid(x @ weight.T + bias)
    return t * x + (1.0 - t) * y


if __name__ == "__main__":
    # Small shapes: batch=4, seq=13 -> N=52 rows (deliberately NOT tile-aligned,
    # exercising the ragged masked last block); in_out_size D=32.
    N, D = 52, 32
    key = jax.random.PRNGKey(0)
    kx, ky, kw, kb = jax.random.split(key, 4)

    x = jax.random.normal(kx, (N, D), dtype=jnp.float32)
    y = jax.random.normal(ky, (N, D), dtype=jnp.float32)

    # Deterministic parameter init (mimics nn.Linear's uniform(-1/sqrt(D), 1/sqrt(D)))
    bound = 1.0 / (D ** 0.5)
    weight = jax.random.uniform(kw, (D, D), minval=-bound, maxval=bound,
                                dtype=jnp.float32)
    bias = jax.random.uniform(kb, (D,), minval=-bound, maxval=bound,
                              dtype=jnp.float32)

    out = highway_gate(x, y, weight, bias)
    out = jax.block_until_ready(out)

    ref = highway_gate_ref(x, y, weight, bias)
    assert out.shape == ref.shape
    assert jnp.allclose(out, ref, atol=1e-5, rtol=1e-5), "mismatch vs reference"

    print("KERNEL_OK")
</pallas_src>

<mosaic_0001>
module attributes {stable_mosaic.version = 11 : i64} {
  func.func @_highway_gate_kernel(%arg0: i32, %arg1: memref<56x128xf32, #tpu.memory_space<vmem>>, %arg2: memref<56x128xf32, #tpu.memory_space<vmem>>, %arg3: memref<128x128xf32, #tpu.memory_space<vmem>>, %arg4: memref<1x128xf32, #tpu.memory_space<vmem>>, %arg5: memref<56x128xf32, #tpu.memory_space<vmem>>) attributes {dimension_semantics = [#tpu.dimension_semantics<parallel>], iteration_bounds = array<i64: 1>, scalar_prefetch = 0 : i64, scratch_operands = 0 : i64, tpu.core_type = #tpu.core_type<tc>, window_params = [{transform_indices = @transform_0, window_bounds = array<i64: 56, 128>}, {transform_indices = @transform_1, window_bounds = array<i64: 56, 128>}, {pipeline_mode = #tpu.pipeline_mode<synchronous>, transform_indices = @transform_2, window_bounds = array<i64: 128, 128>}, {pipeline_mode = #tpu.pipeline_mode<synchronous>, transform_indices = @transform_3, window_bounds = array<i64: 1, 128>}, {transform_indices = @transform_4, window_bounds = array<i64: 56, 128>}]} {
    %c0 = arith.constant 0 : index
    %c0_0 = arith.constant 0 : index
    %0 = vector.load %arg1[%c0, %c0_0] : memref<56x128xf32, #tpu.memory_space<vmem>>, vector<56x128xf32>
    %c0_1 = arith.constant 0 : index
    %c0_2 = arith.constant 0 : index
    %1 = vector.load %arg2[%c0_1, %c0_2] : memref<56x128xf32, #tpu.memory_space<vmem>>, vector<56x128xf32>
    %c0_3 = arith.constant 0 : index
    %c0_4 = arith.constant 0 : index
    %2 = vector.load %arg3[%c0_3, %c0_4] : memref<128x128xf32, #tpu.memory_space<vmem>>, vector<128x128xf32>
    %cst = arith.constant dense<0.000000e+00> : vector<56x128xf32>
    %3 = tpu.matmul %0, %2, %cst {dimension_numbers = #tpu.dot_dimension_numbers<[1], [0], [0], [1], [0, 0, 1, 1], [], []>} : vector<56x128xf32>, vector<128x128xf32>, vector<56x128xf32> -> vector<56x128xf32>
    %c0_5 = arith.constant 0 : index
    %c0_6 = arith.constant 0 : index
    %4 = vector.load %arg4[%c0_5, %c0_6] : memref<1x128xf32, #tpu.memory_space<vmem>>, vector<1x128xf32>
    %5 = vector.broadcast %4 : vector<1x128xf32> to vector<56x128xf32>
    %6 = arith.addf %3, %5 : vector<56x128xf32>
    %7 = arith.negf %6 : vector<56x128xf32>
    %8 = math.exp %7 : vector<56x128xf32>
    %cst_7 = arith.constant 1.000000e+00 : f32
    %9 = vector.broadcast %cst_7 : f32 to vector<56x128xf32>
    %10 = arith.addf %9, %8 : vector<56x128xf32>
    %11 = arith.divf %9, %10 : vector<56x128xf32>
    %12 = arith.subf %0, %1 : vector<56x128xf32>
    %13 = arith.mulf %11, %12 : vector<56x128xf32>
    %14 = arith.addf %1, %13 : vector<56x128xf32>
    %c0_8 = arith.constant 0 : index
    %c0_9 = arith.constant 0 : index
    %15 = vector.load %arg5[%c0_8, %c0_9] : memref<56x128xf32, #tpu.memory_space<vmem>>, vector<56x128xf32>
    tpu.vector_store %arg5[%c0_8, %c0_9], %14 {strides = array<i32>} : memref<56x128xf32, #tpu.memory_space<vmem>>, vector<56x128xf32>,
    return
  }
  func.func @transform_0(%arg0: i32) -> (i32, i32) {
    %c0_i32 = arith.constant 0 : i32
    %c0_i32_0 = arith.constant 0 : i32
    return %arg0, %c0_i32 : i32, i32
  }
  func.func @transform_1(%arg0: i32) -> (i32, i32) {
    %c0_i32 = arith.constant 0 : i32
    %c0_i32_0 = arith.constant 0 : i32
    return %arg0, %c0_i32 : i32, i32
  }
  func.func @transform_2(%arg0: i32) -> (i32, i32) {
    %c0_i32 = arith.constant 0 : i32
    %c0_i32_0 = arith.constant 0 : i32
    %c0_i32_1 = arith.constant 0 : i32
    return %c0_i32, %c0_i32_0 : i32, i32
  }
  func.func @transform_3(%arg0: i32) -> (i32, i32) {
    %c0_i32 = arith.constant 0 : i32
    %c0_i32_0 = arith.constant 0 : i32
    %c0_i32_1 = arith.constant 0 : i32
    return %c0_i32, %c0_i32_0 : i32, i32
  }
  func.func @transform_4(%arg0: i32) -> (i32, i32) {
    %c0_i32 = arith.constant 0 : i32
    %c0_i32_0 = arith.constant 0 : i32
    return %arg0, %c0_i32 : i32, i32
  }
}

</mosaic_0001>

<bundles_post_ra>
// kernel: tpu_custom_call.1
= control target key start
LH: loop header
LB: loop body
LE: loop exit
PB: predicated region body
PF: predicated region fallthrough
CT: control target
= control target key end

     0   :  { %9 = vsyncpa [#allocation3], 0  ;;  %s679_s0 = inlined_call_operand.hbm [shape: f32[52,128], index: 0, kind: input, shape index: {}]   ;;  %s680_s1 = inlined_call_operand.hbm [shape: f32[52,128], index: 1, kind: input, shape index: {}]   ;;  %s681_s2 = inlined_call_operand.hbm [shape: f32[128,128], index: 2, kind: input, shape index: {}]   ;;  %s682_s3 = inlined_call_operand.vmem [shape: f32[1,128], index: 3, kind: input, shape index: {}]   ;;  %s683_s4 = inlined_call_operand.hbm [shape: f32[52,128], index: 4, kind: output, shape index: {}]  }
   0x1   :  { %10 = vsyncpa [#allocation6], 0 }
   0x2   :  { %11 = vsyncpa [#allocation4], 0  ;;  %s29_s17 = sshll.u32 %s680_s1, 4  ;;  %s510_s18 = smov [#allocation5]   ;;  %s30_s17 = int_to_ptr.hbm [resolvable:$true] %s29_s17 }
   0x3   :  { %s31_s19 = sshll.u32 %s510_s18, 4  ;;  %s16_s22 = sshll.u32 %s679_s0, 4  ;;  %s32_s19 = int_to_ptr.vmem [resolvable:$true] %s31_s19  ;;  %s17_s22 = int_to_ptr.hbm [resolvable:$true] %s16_s22 }
   0x4   :  { %s511_s23 = smov 128   ;;  %s512_s24 = smov 8  }
   0x5   :  { %37 = dma.hbm_to_vmem [thread:$0]  %s30_s17, 896, %s32_s19, [#allocation6], %s511_s23, %s511_s23, %s512_s24  }
   0x6   :  { %s513_s25 = smov [#allocation2]   ;;  %s42_s1 = sshll.u32 %s681_s2, 4  ;;  %s43_s1 = int_to_ptr.hbm [resolvable:$true] %s42_s1 }
   0x7   :  { %s18_s26 = sshll.u32 %s513_s25, 4  ;;  %s514_s0 = smov [#allocation7]   ;;  %s19_s26 = int_to_ptr.vmem [resolvable:$true] %s18_s26 }
   0x8   :  { %24 = dma.hbm_to_vmem [thread:$0]  %s17_s22, 896, %s19_s26, [#allocation3], %s511_s23, %s511_s23, %s512_s24  }
   0x9   :  { %s44_s29 = sshll.u32 %s514_s0, 4  ;;  %s45_s29 = int_to_ptr.vmem [resolvable:$true] %s44_s29 }
   0xa   :  { %50 = dma.hbm_to_vmem [thread:$0]  %s43_s1, 2048, %s45_s29, [#allocation6], %s511_s23, %s511_s23, %s512_s24  }
   0xb   :  { %504 = dma.done.wait [#allocation3], 896  }
   0xc   :  { %505 = vsyncadd [#allocation3], 4294966400 }
   0xd   :  { %506 = dma.done.wait [#allocation6], 2944  }
   0xe   :  { %507 = vsyncadd [#allocation6], 4294964352  ;;  %v94_v0 = vld [vmem:[#allocation7 + $0x78] sm:$0xff]  ;;  %v93_v1 = vld [vmem:[#allocation7 + $0x70] sm:$0xff]  ;;  %s304_s8 = sshll.u32 %s683_s4, 4  ;;  %s305_s8 = int_to_ptr.hbm [resolvable:$true] %s304_s8 }
   0xf   :  { %99 = vmatpush.msra.mxu0 %v94_v0  ;;  %326 = vmatpush.msra.mxu2 %v94_v0  ;;  %v92_v2 = vld [vmem:[#allocation7 + $0x68] sm:$0xff]  ;;  %v91_v3 = vld [vmem:[#allocation7 + $0x60] sm:$0xff]  ;;  %v90_v4 = vld [vmem:[#allocation7 + $0x58] sm:$0xff] }
  0x10   :  { %327 = vmatpush.msra.mxu3 %v94_v0  ;;  %325 = vmatpush.msra.mxu1 %v94_v0  ;;  %v89_v5 = vld [vmem:[#allocation7 + $0x50] sm:$0xff]  ;;  %v88_v6 = vld [vmem:[#allocation7 + $0x48] sm:$0xff]  ;;  %v87_v7 = vld [vmem:[#allocation7 + $0x40] sm:$0xff] }
  0x11   :  { %100 = vmatpush.msra.mxu0 %v93_v1  ;;  %329 = vmatpush.msra.mxu2 %v93_v1  ;;  %v86_v8 = vld [vmem:[#allocation7 + $0x38] sm:$0xff]  ;;  %v85_v9 = vld [vmem:[#allocation7 + $0x30] sm:$0xff]  ;;  %v84_v10 = vld [vmem:[#allocation7 + $0x28] sm:$0xff] }
  0x12   :  { %330 = vmatpush.msra.mxu3 %v93_v1  ;;  %328 = vmatpush.msra.mxu1 %v93_v1  ;;  %v83_v11 = vld [vmem:[#allocation7 + $0x20] sm:$0xff]  ;;  %v82_v12 = vld [vmem:[#allocation7 + $0x18] sm:$0xff]  ;;  %v81_v13 = vld [vmem:[#allocation7 + $0x10] sm:$0xff] }
  0x13   :  { %101 = vmatpush.msra.mxu0 %v92_v2  ;;  %332 = vmatpush.msra.mxu2 %v92_v2  ;;  %v80_v14 = vld [vmem:[#allocation7 + $0x8] sm:$0xff]  ;;  %v79_v15 = vld [vmem:[#allocation7] sm:$0xff]  ;;  %v559_v16 = vld [vmem:[#allocation2] sm:$0xff] }
  0x14   :  { %333 = vmatpush.msra.mxu3 %v92_v2  ;;  %331 = vmatpush.msra.mxu1 %v92_v2  ;;  %v561_v17 = vld [vmem:[#allocation2 + $0x18] sm:$0xff]  ;;  %v563_v18 = vld [vmem:[#allocation2 + $0x28] sm:$0xff]  ;;  %v565_v19 = vld [vmem:[#allocation2 + $0x10] sm:$0xff] }
  0x15   :  { %102 = vmatpush.msra.mxu0 %v91_v3  ;;  %335 = vmatpush.msra.mxu2 %v91_v3  ;;  %v571_v20 = vld [vmem:[#allocation2 + $0x8] sm:$0xff]  ;;  %v573_v21 = vld [vmem:[#allocation2 + $0x20] sm:$0xff]  ;;  %v575_v22 = vld [vmem:[#allocation2 + $0x30] sm:$0xff] }
  0x16   :  { %336 = vmatpush.msra.mxu3 %v91_v3  ;;  %334 = vmatpush.msra.mxu1 %v91_v3  ;;  %v379_v23 = vld [vmem:[%s682_s3] ss:$0 sm:$0xff]  ;;  %v583_v44 = vld [vmem:[#allocation5] sm:$0xff]  ;;  %v585_v45 = vld [vmem:[#allocation5 + $0x18] sm:$0xff]  ;;  %s515_s3 = smov [#allocation8]  }
  0x17   :  { %103 = vmatpush.msra.mxu0 %v90_v4  ;;  %338 = vmatpush.msra.mxu2 %v90_v4  ;;  %v587_v46 = vld [vmem:[#allocation5 + $0x28] sm:$0xff]  ;;  %v589_v50 = vld [vmem:[#allocation5 + $0x10] sm:$0xff]  ;;  %v270_v52 = vsub.f32 %v559_v16, %v583_v44  ;;  %v273_v57 = vsub.f32 %v561_v17, %v585_v45  ;;  %s302_s5 = sshll.u32 %s515_s3, 4  ;;  %s303_s5 = int_to_ptr.vmem [resolvable:$true] %s302_s5 }
  0x18   :  { %339 = vmatpush.msra.mxu3 %v90_v4  ;;  %337 = vmatpush.msra.mxu1 %v90_v4  ;;  %v275_v58 = vsub.f32 %v563_v18, %v587_v46  ;;  %v272_v62 = vsub.f32 %v565_v19, %v589_v50 }
  0x19   :  { %104 = vmatpush.msra.mxu0 %v89_v5  ;;  %341 = vmatpush.msra.mxu2 %v89_v5 }
  0x1a   :  { %342 = vmatpush.msra.mxu3 %v89_v5  ;;  %340 = vmatpush.msra.mxu1 %v89_v5 }
  0x1b   :  { %105 = vmatpush.msra.mxu0 %v88_v6  ;;  %344 = vmatpush.msra.mxu2 %v88_v6 }
  0x1c   :  { %345 = vmatpush.msra.mxu3 %v88_v6  ;;  %343 = vmatpush.msra.mxu1 %v88_v6 }
  0x1d   :  { %106 = vmatpush.msra.mxu0 %v87_v7  ;;  %347 = vmatpush.msra.mxu2 %v87_v7 }
  0x1e   :  { %348 = vmatpush.msra.mxu3 %v87_v7  ;;  %346 = vmatpush.msra.mxu1 %v87_v7 }
  0x1f   :  { %107 = vmatpush.msra.mxu0 %v86_v8  ;;  %350 = vmatpush.msra.mxu2 %v86_v8 }
  0x20   :  { %351 = vmatpush.msra.mxu3 %v86_v8  ;;  %349 = vmatpush.msra.mxu1 %v86_v8 }
  0x21   :  { %108 = vmatpush.msra.mxu0 %v85_v9  ;;  %353 = vmatpush.msra.mxu2 %v85_v9 }
  0x22   :  { %354 = vmatpush.msra.mxu3 %v85_v9  ;;  %352 = vmatpush.msra.mxu1 %v85_v9 }
  0x23   :  { %109 = vmatpush.msra.mxu0 %v84_v10  ;;  %356 = vmatpush.msra.mxu2 %v84_v10 }
  0x24   :  { %357 = vmatpush.msra.mxu3 %v84_v10  ;;  %355 = vmatpush.msra.mxu1 %v84_v10 }
  0x25   :  { %110 = vmatpush.msra.mxu0 %v83_v11  ;;  %359 = vmatpush.msra.mxu2 %v83_v11 }
  0x26   :  { %360 = vmatpush.msra.mxu3 %v83_v11  ;;  %358 = vmatpush.msra.mxu1 %v83_v11 }
  0x27   :  { %111 = vmatpush.msra.mxu0 %v82_v12  ;;  %362 = vmatpush.msra.mxu2 %v82_v12 }
  0x28   :  { %363 = vmatpush.msra.mxu3 %v82_v12  ;;  %361 = vmatpush.msra.mxu1 %v82_v12 }
  0x29   :  { %112 = vmatpush.msra.mxu0 %v81_v13  ;;  %365 = vmatpush.msra.mxu2 %v81_v13 }
  0x2a   :  { %366 = vmatpush.msra.mxu3 %v81_v13  ;;  %364 = vmatpush.msra.mxu1 %v81_v13 }
  0x2b   :  { %113 = vmatpush.msra.mxu0 %v80_v14  ;;  %368 = vmatpush.msra.mxu2 %v80_v14 }
  0x2c   :  { %369 = vmatpush.msra.mxu3 %v80_v14  ;;  %367 = vmatpush.msra.mxu1 %v80_v14 }
  0x2d   :  { %114 = vmatpush.msra.mxu0 %v79_v15  ;;  %371 = vmatpush.msra.mxu2 %v79_v15 }
  0x2e   :  { %372 = vmatpush.msra.mxu3 %v79_v15  ;;  %370 = vmatpush.msra.mxu1 %v79_v15 }
  0x2f   :  { %115 = vmatmul.f32.vlgmr.msra.gmra.mxu0 %v559_v16  ;;  %124 = vmatmul.f32.vlgmr.msra.gmra.mxu2 %v561_v17 }
  0x30   :  { %130 = vmatmul.f32.vlgmr.msra.gmra.mxu3 %v563_v18  ;;  %121 = vmatmul.f32.vlgmr.msra.gmra.mxu1 %v565_v19 }
  0x37   :  { %118 = vmatmul.f32.gmra.mxu0 %v571_v20  ;;  %127 = vmatmul.f32.gmra.mxu2 %v573_v21 }
  0x38   :  { %133 = vmatmul.f32.gmra.mxu3 %v575_v22 }
  0xac   :  { %v116_v24 = vpop.f32.mrf.mxu0 }
  0xad   :  { %v117_v25 = vadd.f32 %v379_v23, %v116_v24  ;;  %v122_v26 = vpop.f32.mrf.mxu1 }
  0xae   :  { %v123_v27 = vadd.f32 %v379_v23, %v122_v26 }
  0xaf   :  { %v318_v28 = vmul.f32 -1.442695, %v117_v25 }
  0xb0   :  { %v320_v29 = vmul.f32 -1.442695, %v123_v27 }
  0xb1   :  { %380 = vpow2.f32 %v318_v28 }
  0xb2   :  { %382 = vpow2.f32 %v320_v29  ;;  %v125_v30 = vpop.f32.mrf.mxu2 }
  0xb3   :  { %v126_v31 = vadd.f32 %v379_v23, %v125_v30  ;;  %v131_v32 = vpop.f32.mrf.mxu3 }
  0xb4   :  { %v132_v33 = vadd.f32 %v379_v23, %v131_v32  ;;  %v119_v34 = vpop.f32.mrf.mxu0 }
  0xb5   :  { %v321_v35 = vmul.f32 -1.442695, %v126_v31  ;;  %v120_v36 = vadd.f32 %v379_v23, %v119_v34 }
  0xb6   :  { %v323_v37 = vmul.f32 -1.442695, %v132_v33 }
  0xb7   :  { %v381_v38 = vpop.eup %380  ;;  %384 = vpow2.f32 %v321_v35  ;;  %v319_v39 = vmul.f32 -1.442695, %v120_v36 }
  0xb8   :  { %v383_v40 = vpop.eup %382  ;;  %v158_v41 = vadd.f32 1.0, %v381_v38  ;;  %386 = vpow2.f32 %v323_v37 }
  0xb9   :  { %v160_v42 = vadd.f32 1.0, %v383_v40  ;;  %388 = vpow2.f32 %v319_v39 }
  0xba   :  { %390 = vrcp.f32 %v158_v41  ;;  %v128_v43 = vpop.f32.mrf.mxu2  ;;  %v174_v53 = vand.u32 2147483647, %v158_v41  ;;  %v176_v54 = vand.u32 2147483648, %v158_v41  ;;  %vm170_vm0 = vweird.f32 %v158_v41 }
  0xbb   :  { %392 = vrcp.f32 %v160_v42  ;;  %v129_v47 = vadd.f32 %v379_v23, %v128_v43  ;;  %v134_v48 = vpop.f32.mrf.mxu3  ;;  %vm200_vm1 = vweird.f32 %v160_v42  ;;  %v204_v2 = vand.u32 2147483647, %v160_v42 }
  0xbc   :  { %v135_v60 = vadd.f32 %v379_v23, %v134_v48  ;;  %vm605_vm2 = vcmp.eq.f32.partialorder %v174_v53, 8.507059e+37  ;;  %v177_v4 = vor.u32 1.1754944e-38, %v176_v54  ;;  %v206_v6 = vand.u32 2147483648, %v160_v42 }
  0xbd   :  { %v385_v49 = vpop.eup %384  ;;  %v322_v63 = vmul.f32 -1.442695, %v129_v47  ;;  %vm615_vm5 = vcmp.eq.f32.partialorder %v204_v2, 8.507059e+37 }
  0xbe   :  { %v387_v51 = vpop.eup %386  ;;  %v593_v55 = vadd.f32 1.0, %v385_v49  ;;  %v324_v10 = vmul.f32 -1.442695, %v135_v60  ;;  %v207_v23 = vor.u32 1.1754944e-38, %v206_v6 }
  0xbf   :  { %v389_v56 = vpop.eup %388  ;;  %v599_v59 = vadd.f32 1.0, %v387_v51 }
  0xc0   :  { %v391_v61 = vpop.eup %390  ;;  %394 = vrcp.f32 %v593_v55  ;;  %v219_v8 = vand.u32 2147483647, %v593_v55  ;;  %v610_v9 = vadd.f32 1.0, %v389_v56  ;;  %v221_v12 = vand.u32 2147483648, %v593_v55 }
  0xc1   :  { %v393_v0 = vpop.eup %392  ;;  %v166_v1 = vmul.f32 %v391_v61, %v158_v41  ;;  %396 = vrcp.f32 %v599_v59  ;;  %vm171_vm4 = vweird.f32 %v391_v61  ;;  %v249_v14 = vand.u32 2147483647, %v599_v59 }
  0xc2   :  { %v196_v5 = vmul.f32 %v393_v0, %v160_v42  ;;  %vm201_vm3 = vweird.f32 %v393_v0  ;;  %398 = vpow2.f32 %v322_v63  ;;  %vm215_vm6 = vweird.f32 %v593_v55  ;;  %vm172_vm9 = vmor %vm170_vm0, %vm171_vm4 }
  0xc3   :  { %v167_v7 = vsub.f32 1.0, %v166_v1  ;;  %400 = vrcp.f32 %v610_v9  ;;  %vm621_vm7 = vmor %vm200_vm1, %vm201_vm3  ;;  %vm245_vm8 = vweird.f32 %v599_v59  ;;  %vm628_vm10 = vcmp.eq.f32.partialorder %v219_v8, 8.507059e+37 }
  0xc4   :  { %v197_v11 = vsub.f32 1.0, %v196_v5  ;;  %402 = vpow2.f32 %v324_v10  ;;  %v222_v30 = vor.u32 1.1754944e-38, %v221_v12  ;;  %vm633_vm11 = vcmp.eq.f32.partialorder %v249_v14, 8.507059e+37 }
  0xc5   :  { %v168_v13 = vmul.f32 %v391_v61, %v167_v7  ;;  %v251_v35 = vand.u32 2147483648, %v599_v59  ;;  %vm185_vm15 = vweird.f32 %v610_v9  ;;  %v191_v1 = vand.u32 2147483648, %v610_v9 }
  0xc6   :  { %v395_v15 = vpop.eup %394  ;;  %v198_v16 = vmul.f32 %v393_v0, %v197_v11 }
  0xc7   :  { %v397_v24 = vpop.eup %396  ;;  %v169_v25 = vadd.f32 %v391_v61, %v168_v13  ;;  %v211_v27 = vmul.f32 %v395_v15, %v593_v55  ;;  %vm216_vm12 = vweird.f32 %v395_v15  ;;  %v252_v60 = vor.u32 1.1754944e-38, %v251_v35 }
  0xc8   :  { %v199_v28 = vadd.f32 %v393_v0, %v198_v16  ;;  %v241_v31 = vmul.f32 %v397_v24, %v599_v59  ;;  %v399_v36 = vpop.eup %398  ;;  %vm246_vm13 = vweird.f32 %v397_v24  ;;  %vm217_vm14 = vmor %vm215_vm6, %vm216_vm12  ;;  %v192_v11 = vor.u32 1.1754944e-38, %v191_v1 }
  0xc9   :  { %v173_v32 = vsel %vm172_vm9, %v391_v61, %v169_v25  ;;  %v212_v33 = vsub.f32 1.0, %v211_v27  ;;  %v401_v40 = vpop.eup %400  ;;  %v162_v47 = vadd.f32 1.0, %v399_v36  ;;  %vm247_vm0 = vmor %vm245_vm8, %vm246_vm13  ;;  %v78_v25 = vld [vmem:[#allocation5 + $0x30] sm:$0xff] }
  0xca   :  { %v178_v37 = vsel %vm605_vm2, %v177_v4, %v173_v32  ;;  %v203_v38 = vsel %vm621_vm7, %v393_v0, %v199_v28  ;;  %v242_v39 = vsub.f32 1.0, %v241_v31  ;;  %v181_v51 = vmul.f32 %v401_v40, %v610_v9  ;;  %v403_v53 = vpop.eup %402 }
  0xcb   :  { %v277_v41 = vmul.f32 %v270_v52, %v178_v37  ;;  %v208_v42 = vsel %vm615_vm5, %v207_v23, %v203_v38  ;;  %v213_v43 = vmul.f32 %v395_v15, %v212_v33  ;;  %404 = vrcp.f32 %v162_v47 }
  0xcc   :  { %v279_v48 = vmul.f32 %v272_v62, %v208_v42  ;;  %v243_v49 = vmul.f32 %v397_v24, %v242_v39  ;;  %v182_v63 = vsub.f32 1.0, %v181_v51  ;;  %v73_v62 = vld [vmem:[#allocation5 + $0x8] sm:$0xff]  ;;  %vm186_vm1 = vweird.f32 %v401_v40 }
  0xcd   :  { %v284_v54 = vadd.f32 %v277_v41, %v583_v44  ;;  %v214_v56 = vadd.f32 %v395_v15, %v213_v43  ;;  %v189_v44 = vand.u32 2147483647, %v610_v9  ;;  %v271_v5 = vsub.f32 %v571_v20, %v73_v62  ;;  %vm187_vm2 = vmor %vm185_vm15, %vm186_vm1 }
  0xce   :  { %v286_v61 = vadd.f32 %v279_v48, %v589_v50  ;;  %v244_v52 = vadd.f32 %v397_v24, %v243_v49  ;;  %v164_v50 = vadd.f32 1.0, %v403_v53  ;;  %v183_v3 = vmul.f32 %v401_v40, %v182_v63 }
  0xcf   :  { %291 = vst [vmem:[#allocation8] sm:$0xff] %v284_v54  ;;  %v218_v0 = vsel %vm217_vm14, %v395_v15, %v214_v56  ;;  %vm190_vm3 = vcmp.eq.f32.partialorder %v189_v44, 8.507059e+37  ;;  %v234_v15 = vand.u32 2147483647, %v162_v47  ;;  %v236_v16 = vand.u32 2147483648, %v162_v47 }
  0xd0   :  { %293 = vst [vmem:[#allocation8 + $0x10] sm:$0xff] %v286_v61  ;;  %v223_v55 = vsel %vm628_vm10, %v222_v30, %v218_v0  ;;  %v248_v2 = vsel %vm247_vm0, %v397_v24, %v244_v52  ;;  %406 = vrcp.f32 %v164_v50  ;;  %v184_v7 = vadd.f32 %v401_v40, %v183_v3 }
  0xd1   :  { %v280_v4 = vmul.f32 %v273_v57, %v223_v55  ;;  %v253_v59 = vsel %vm633_vm11, %v252_v60, %v248_v2  ;;  %v405_v8 = vpop.eup %404  ;;  %vm230_vm5 = vweird.f32 %v162_v47  ;;  %vm235_vm7 = vcmp.eq.f32.partialorder %v234_v15, 8.507059e+37 }
  0xd2   :  { %v282_v6 = vmul.f32 %v275_v58, %v253_v59  ;;  %v188_v57 = vsel %vm187_vm2, %v401_v40, %v184_v7  ;;  %v226_v12 = vmul.f32 %v405_v8, %v162_v47  ;;  %v76_v58 = vld [vmem:[#allocation5 + $0x20] sm:$0xff]  ;;  %vm231_vm4 = vweird.f32 %v405_v8 }
  0xd3   :  { %v287_v10 = vadd.f32 %v280_v4, %v585_v45  ;;  %v193_v13 = vsel %vm190_vm3, %v192_v11, %v188_v57  ;;  %v274_v23 = vsub.f32 %v573_v21, %v76_v58  ;;  %vm232_vm6 = vmor %vm230_vm5, %vm231_vm4  ;;  %v237_v26 = vor.u32 1.1754944e-38, %v236_v16 }
  0xd4   :  { %v289_v17 = vadd.f32 %v282_v6, %v587_v46  ;;  %v278_v20 = vmul.f32 %v271_v5, %v193_v13  ;;  %v227_v14 = vsub.f32 1.0, %v226_v12  ;;  %v266_v27 = vand.u32 2147483648, %v164_v50 }
  0xd5   :  { %294 = vst [vmem:[#allocation8 + $0x18] sm:$0xff] %v287_v10  ;;  %v264_v30 = vand.u32 2147483647, %v164_v50  ;;  %v276_v32 = vsub.f32 %v575_v22, %v78_v25  ;;  %vm260_vm9 = vweird.f32 %v164_v50 }
  0xd6   :  { %296 = vst [vmem:[#allocation8 + $0x28] sm:$0xff] %v289_v17  ;;  %v407_v18 = vpop.eup %406  ;;  %v285_v19 = vadd.f32 %v278_v20, %v73_v62  ;;  %v228_v45 = vmul.f32 %v405_v8, %v227_v14  ;;  %v267_v21 = vor.u32 1.1754944e-38, %v266_v27 }
  0xd7   :  { %v256_v9 = vmul.f32 %v407_v18, %v164_v50  ;;  %vm261_vm8 = vweird.f32 %v407_v18  ;;  %vm265_vm11 = vcmp.eq.f32.partialorder %v264_v30, 8.507059e+37 }
  0xd8   :  { %292 = vst [vmem:[#allocation8 + $0x8] sm:$0xff] %v285_v19  ;;  %v229_v46 = vadd.f32 %v405_v8, %v228_v45  ;;  %vm262_vm10 = vmor %vm260_vm9, %vm261_vm8 }
  0xd9   :  { %v257_v24 = vsub.f32 1.0, %v256_v9 }
  0xda   :  { %v233_v28 = vsel %vm232_vm6, %v405_v8, %v229_v46 }
  0xdb   :  { %v258_v29 = vmul.f32 %v407_v18, %v257_v24  ;;  %v238_v31 = vsel %vm235_vm7, %v237_v26, %v233_v28 }
  0xdc   :  { %v281_v33 = vmul.f32 %v274_v23, %v238_v31 }
  0xdd   :  { %v259_v34 = vadd.f32 %v407_v18, %v258_v29 }
  0xde   :  { %v288_v35 = vadd.f32 %v281_v33, %v76_v58 }
  0xdf   :  { %v263_v36 = vsel %vm262_vm10, %v407_v18, %v259_v34 }
  0xe0   :  { %v268_v37 = vsel %vm265_vm11, %v267_v21, %v263_v36  ;;  %295 = vst [vmem:[#allocation8 + $0x20] sm:$0xff] %v288_v35 }
  0xe1   :  { %v283_v38 = vmul.f32 %v276_v32, %v268_v37 }
  0xe3   :  { %v290_v39 = vadd.f32 %v283_v38, %v78_v25 }
  0xe5   :  { %297 = vst [vmem:[#allocation8 + $0x30] sm:$0xff] %v290_v39 }
  0xe6   :  { %310 = dma.vmem_to_hbm [thread:$0]  %s303_s5, 896, %s305_s8, [#allocation4], %s511_s23, %s511_s23, %s512_s24  }
  0xe7   :  { %508 = dma.done.wait [#allocation4], 896  }
  0xe8   :  { %509 = vsyncadd [#allocation4], 4294966400 }
  0xe9   :  { %315 = vsyncpa [#allocation3], 1 }
  0xea   :  { %316 = vsyncpa [#allocation6], 1 }
  0xeb   :  { %317 = vsyncpa [#allocation4], 1 }

</bundles_post_ra>
